<compile_context>
chip_gen: v6e
topology: v6e:2x2x1
jax: 0.10.0
libtpu: 0.0.40
codegen_flags: <defaults>
</compile_context>

<pallas_src>
import jax
import jax.numpy as jnp
from jax.experimental import pallas as pl
from jax.experimental.pallas import tpu as pltpu


def _fbn_kernel(x_ref, s_ref, b_ref, o_ref):
    # x_ref/o_ref: (tile_rows, tile_lanes). s_ref/b_ref: full (nc_param, 1),
    # f32, resident in VMEM across the whole grid; slice out this block's rows.
    tile_rows = x_ref.shape[0]
    row0 = pl.multiple_of(pl.program_id(0) * tile_rows, tile_rows)
    s = s_ref[pl.ds(row0, tile_rows), :]
    b = b_ref[pl.ds(row0, tile_rows), :]
    o_ref[...] = (x_ref[...] * s + b).astype(o_ref.dtype)


def _round_up(v, m):
    return ((v + m - 1) // m) * m


def frozen_batch_norm_2d(x, weight, bias, running_mean, running_var):
    """FrozenBatchNorm2d forward. x is NCHW; weight/bias/rm/rv are (C,)."""
    n, c, h, w = x.shape
    nc = n * c
    hw = h * w
    itemsize = x.dtype.itemsize
    sublane = {1: 32, 2: 16, 4: 8}.get(itemsize, 8)

    # Fold the frozen statistics into a per-channel affine, in f32 (tiny glue).
    # No eps, matching this module's forward exactly.
    # TODO(synk): current torchvision FrozenBatchNorm2d adds eps=1e-5 inside
    # rsqrt; add it here if matching that newer variant is desired.
    w32 = weight.astype(jnp.float32)
    b32 = bias.astype(jnp.float32)
    rm32 = running_mean.astype(jnp.float32)
    rv32 = running_var.astype(jnp.float32)
    scale = w32 * jax.lax.rsqrt(rv32)
    shift = b32 - rm32 * scale

    # Lane-dense layout: (N*C, H*W); pad the lane dim to a 128 multiple only
    # when needed (no-op for 128-multiple H*W such as this example).
    hw_pad = _round_up(hw, 128)
    x2d = x.reshape(nc, hw)
    if hw_pad != hw:
        x2d = jnp.pad(x2d, ((0, 0), (0, hw_pad - hw)))

    # Block sizing: target ~4 MiB per x/out block. Double-buffered input +
    # output is ~16 MiB, comfortably inside v7x's 64 MiB physical VMEM while
    # deep into the flat part of the tiling-vs-HBM-roofline curve.
    target_block_bytes = 4 * 1024 * 1024
    tile_lanes = hw_pad
    tile_rows = (target_block_bytes // (tile_lanes * itemsize)) // sublane * sublane
    if tile_rows < sublane:
        # Very large H*W: keep a minimal sublane-aligned row count and split
        # the lane axis with a second grid dimension instead.
        tile_rows = sublane
        tile_lanes = min(
            hw_pad,
            max(128, (target_block_bytes // (tile_rows * itemsize)) // 128 * 128),
        )
    tile_rows = min(tile_rows, _round_up(nc, sublane))

    grid = (pl.cdiv(nc, tile_rows), pl.cdiv(hw_pad, tile_lanes))

    # Per-row affine params in f32, padded to the grid's row extent so the
    # in-kernel dynamic slice never goes out of bounds. DMA'd once (constant
    # index_map) and kept VMEM-resident for the whole grid.
    nc_param = grid[0] * tile_rows
    scale_rows = jnp.pad(jnp.tile(scale, n), (0, nc_param - nc)).reshape(nc_param, 1)
    shift_rows = jnp.pad(jnp.tile(shift, n), (0, nc_param - nc)).reshape(nc_param, 1)

    block_bytes = tile_rows * tile_lanes * itemsize
    vmem_limit = min(4 * block_bytes + 8 * 1024 * 1024, 48 * 1024 * 1024)

    out2d = pl.pallas_call(
        _fbn_kernel,
        out_shape=jax.ShapeDtypeStruct((nc, hw_pad), x.dtype),
        grid_spec=pltpu.PrefetchScalarGridSpec(
            num_scalar_prefetch=0,
            grid=grid,
            in_specs=[
                pl.BlockSpec((tile_rows, tile_lanes), lambda i, j: (i, j)),
                pl.BlockSpec((nc_param, 1), lambda i, j: (0, 0)),
                pl.BlockSpec((nc_param, 1), lambda i, j: (0, 0)),
            ],
            out_specs=pl.BlockSpec((tile_rows, tile_lanes), lambda i, j: (i, j)),
        ),
        compiler_params=pltpu.CompilerParams(
            dimension_semantics=("parallel", "parallel"),
            vmem_limit_bytes=vmem_limit,
        ),
        cost_estimate=pl.CostEstimate(
            flops=2 * nc * hw,
            transcendentals=0,
            bytes_accessed=2 * nc * hw_pad * itemsize + 2 * nc_param * 4,
        ),
    )(x2d, scale_rows, shift_rows)

    if hw_pad != hw:
        out2d = out2d[:, :hw]
    return out2d.reshape(n, c, h, w)


if __name__ == "__main__":
    key = jax.random.PRNGKey(0)
    k_x, k_w, k_b, k_rm, k_rv = jax.random.split(key, 5)

    N, C, H, W = 2, 4, 16, 16
    x = jax.random.normal(k_x, (N, C, H, W), dtype=jnp.float32)

    # Deterministic "frozen" buffers (shapes from __init__: (C,) each), with
    # non-trivial values so the kernel is actually exercised.
    weight = 1.0 + 0.1 * jax.random.normal(k_w, (C,), dtype=jnp.float32)
    bias = 0.1 * jax.random.normal(k_b, (C,), dtype=jnp.float32)
    running_mean = 0.05 * jax.random.normal(k_rm, (C,), dtype=jnp.float32)
    running_var = 1.0 + 0.1 * jax.nn.softplus(
        jax.random.normal(k_rv, (C,), dtype=jnp.float32)
    )

    out = frozen_batch_norm_2d(x, weight, bias, running_mean, running_var)
    out = jax.block_until_ready(out)

    # Pure-JAX reference (mirrors the PyTorch forward exactly).
    w4 = weight.reshape(1, -1, 1, 1)
    b4 = bias.reshape(1, -1, 1, 1)
    rv4 = running_var.reshape(1, -1, 1, 1)
    rm4 = running_mean.reshape(1, -1, 1, 1)
    scale_ref = w4 * jax.lax.rsqrt(rv4)
    bias_ref = b4 - rm4 * scale_ref
    ref = x * scale_ref + bias_ref

    assert out.shape == ref.shape and out.dtype == ref.dtype
    assert jnp.allclose(out, ref, atol=1e-5, rtol=1e-5), "mismatch vs reference"
    print("KERNEL_OK")
</pallas_src>

<mosaic_0001>
module attributes {stable_mosaic.version = 11 : i64} {
  func.func @_fbn_kernel(%arg0: i32, %arg1: i32, %arg2: memref<8x256xf32, #tpu.memory_space<vmem>>, %arg3: memref<8x1xf32, #tpu.memory_space<vmem>>, %arg4: memref<8x1xf32, #tpu.memory_space<vmem>>, %arg5: memref<8x256xf32, #tpu.memory_space<vmem>>) attributes {dimension_semantics = [#tpu.dimension_semantics<parallel>, #tpu.dimension_semantics<parallel>], iteration_bounds = array<i64: 1, 1>, scalar_prefetch = 0 : i64, scratch_operands = 0 : i64, tpu.core_type = #tpu.core_type<tc>, window_params = [{transform_indices = @transform_0, window_bounds = array<i64: 8, 256>}, {pipeline_mode = #tpu.pipeline_mode<synchronous>, transform_indices = @transform_1, window_bounds = array<i64: 8, 1>}, {pipeline_mode = #tpu.pipeline_mode<synchronous>, transform_indices = @transform_2, window_bounds = array<i64: 8, 1>}, {transform_indices = @transform_3, window_bounds = array<i64: 8, 256>}]} {
    %c8_i32 = arith.constant 8 : i32
    %0 = arith.muli %arg0, %c8_i32 : i32
    %1 = tpu.assume_multiple %0, 8 : i32
    %2 = arith.index_cast %1 : i32 to index
    %c0 = arith.constant 0 : index
    %3 = vector.load %arg3[%2, %c0] : memref<8x1xf32, #tpu.memory_space<vmem>>, vector<8x1xf32>
    %4 = arith.index_cast %1 : i32 to index
    %c0_0 = arith.constant 0 : index
    %5 = vector.load %arg4[%4, %c0_0] : memref<8x1xf32, #tpu.memory_space<vmem>>, vector<8x1xf32>
    %c0_1 = arith.constant 0 : index
    %c0_2 = arith.constant 0 : index
    %6 = vector.load %arg2[%c0_1, %c0_2] : memref<8x256xf32, #tpu.memory_space<vmem>>, vector<8x256xf32>
    %7 = vector.broadcast %3 : vector<8x1xf32> to vector<8x256xf32>
    %8 = arith.mulf %6, %7 : vector<8x256xf32>
    %9 = vector.broadcast %5 : vector<8x1xf32> to vector<8x256xf32>
    %10 = arith.addf %8, %9 : vector<8x256xf32>
    %c0_3 = arith.constant 0 : index
    %c0_4 = arith.constant 0 : index
    %11 = vector.load %arg5[%c0_3, %c0_4] : memref<8x256xf32, #tpu.memory_space<vmem>>, vector<8x256xf32>
    tpu.vector_store %arg5[%c0_3, %c0_4], %10 {strides = array<i32>} : memref<8x256xf32, #tpu.memory_space<vmem>>, vector<8x256xf32>,
    return
  }
  func.func @transform_0(%arg0: i32, %arg1: i32) -> (i32, i32) {
    %c0_i32 = arith.constant 0 : i32
    return %arg0, %arg1 : i32, i32
  }
  func.func @transform_1(%arg0: i32, %arg1: i32) -> (i32, i32) {
    %c0_i32 = arith.constant 0 : i32
    %c0_i32_0 = arith.constant 0 : i32
    %c0_i32_1 = arith.constant 0 : i32
    return %c0_i32, %c0_i32_0 : i32, i32
  }
  func.func @transform_2(%arg0: i32, %arg1: i32) -> (i32, i32) {
    %c0_i32 = arith.constant 0 : i32
    %c0_i32_0 = arith.constant 0 : i32
    %c0_i32_1 = arith.constant 0 : i32
    return %c0_i32, %c0_i32_0 : i32, i32
  }
  func.func @transform_3(%arg0: i32, %arg1: i32) -> (i32, i32) {
    %c0_i32 = arith.constant 0 : i32
    return %arg0, %arg1 : i32, i32
  }
}

</mosaic_0001>

<bundles_post_ra>
// kernel: tpu_custom_call.1
= control target key start
LH: loop header
LB: loop body
LE: loop exit
PB: predicated region body
PF: predicated region fallthrough
CT: control target
= control target key end

     0   :  { %v77_v1 = vmov 0   ;;  %s114_s0 = inlined_call_operand.vmem [shape: f32[8,256], index: 0, kind: input, shape index: {}]   ;;  %s115_s1 = inlined_call_operand.vmem [shape: f32[8,1], index: 1, kind: input, shape index: {}]   ;;  %s116_s2 = inlined_call_operand.vmem [shape: f32[8,1], index: 2, kind: input, shape index: {}]   ;;  %s117_s3 = inlined_call_operand.hbm [shape: f32[8,256], index: 3, kind: output, shape index: {}]  }
   0x1   :  { %v17_v0 = vld [vmem:[%s115_s1] sm:$0xff]  ;;  %54 = vset.pattern.permute.xlu0 %v77_v1 }
   0x2   :  { %8 = vsyncpa [#allocation3], 0  ;;  %24 = vperm.xlu0 %54, %v17_v0   ;;  %v19_v2 = vld [vmem:[%s116_s2] sm:$0xff]  ;;  %v21_v4 = vld [vmem:[%s114_s0 + $0x8] sm:$0xff]  ;;  %s78_s20 = smov [#allocation2]  }
   0x3   :  { %v20_v3 = vld [vmem:[%s114_s0] sm:$0xff]  ;;  %s44_s1 = sshll.u32 %s78_s20, 4  ;;  %s45_s1 = int_to_ptr.vmem [resolvable:$true] %s44_s1 }
   0x4   :  { %s55_s2 = scalar_lea.vmem %s45_s1, 256  ;;  %p60_p1 = scmp.lt.s32.totalorder %s45_s1, %s45_s1 }
   0x5   :  { %p56_p0 = scmp.ne.s32.totalorder %s45_s1, %s55_s2  ;;  %p61_p2 = scmp.lt.s32.totalorder %s55_s2, %s55_s2 }
   0x6   :  { %31 = vperm.xlu0 %54, %v19_v2  }
   0x7   :  { %p62_p3 = por %p61_p2, %p60_p1 }
   0x9   :  { %p63_p4 = pnand %p62_p3, %p56_p0 }
  0x7d   :  { %v25_v5 = vpop.permute.xlu0 %24 }
  0x7e   :  { %v27_v6 = vmul.f32 %v25_v5, %v20_v3  ;;  %v28_v7 = vmul.f32 %v25_v5, %v21_v4 }
  0x81   :  { %v32_v8 = vpop.permute.xlu0 %31 }
  0x82   :  { %v34_v9 = vadd.f32 %v32_v8, %v27_v6  ;;  %v35_v10 = vadd.f32 %v32_v8, %v28_v7 }
  0x84   :  { %36 = vst [vmem:[#allocation2] sm:$0xff] %v34_v9  ;;  %37 = vst [vmem:[#allocation2 + $0x8] sm:$0xff] %v35_v10 }
  0x85   :  { %66 = shalt.err (!%p63_p4)
}
  0x86   :  { %47 = dma.vmem_to_hbm [thread:$0]  %s45_s1, 256, %s117_s3, [#allocation3]  }
  0x87   :  { %75 = dma.done.wait [#allocation3], 256  }
  0x88   :  { %76 = vsyncadd [#allocation3], 4294967040 }
  0x89   :  { %51 = vsyncpa [#allocation3], 1 }

</bundles_post_ra>
